<compile_context>
chip_gen: v5e
topology: v5e:2x2
jax: 0.10.0
libtpu: 0.0.40
codegen_flags: <defaults>
</compile_context>

<pallas_src>
import jax
import jax.numpy as jnp
from jax.experimental import pallas as pl
from jax.experimental.pallas import tpu as pltpu


LANES = 128
SUBLANES = 8
TARGET_TILE_BYTES = 4 * 1024 * 1024    # ~4 MiB per block -> 16 MiB double-buffered (in + out)
VMEM_LIMIT_BYTES = 32 * 1024 * 1024    # safe scoped limit on v5e / v6e / v7x


def _exp_kernel(x_ref, o_ref):
    # Pure elementwise exp (EUP); whole tile at once, no extra VPU work.
    o_ref[...] = jnp.exp(x_ref[...])


def _round_down(v, m):
    return (v // m) * m


def _pick_width(n):
    """Largest lane-dense width (multiple of 128, up to 2048) dividing n,
    preferring widths that still leave >= 8 rows.  None -> ragged (pad path)."""
    best = None
    for k in (16, 8, 4, 2, 1):
        w = k * LANES
        if n % w == 0:
            if best is None:
                best = w
            if n // w >= SUBLANES:
                return w
    return best


def exp_pallas(x: jax.Array) -> jax.Array:
    """Elementwise exp matching torch.Tensor.exp() semantics (shape/dtype preserved)."""
    orig_shape = x.shape
    n = x.size
    if n == 0:
        return x

    width = _pick_width(n)
    if width is not None:
        # Pure metadata reshape (row-major contiguous): no extra HBM pass.
        slab = x.reshape(-1, width)
        pad = 0
    else:
        # Ragged fallback: pad flat vector up to a multiple of 128 lanes.
        # TODO(synk): pad + final slice each cost an extra HBM pass; only hit when n % 128 != 0.
        width = LANES
        flat = x.reshape(-1)
        padded = pl.cdiv(n, width) * width
        pad = padded - n
        flat = jnp.pad(flat, (0, pad))
        slab = flat.reshape(-1, width)

    rows = slab.shape[0]
    itemsize = jnp.dtype(slab.dtype).itemsize

    # ~4 MiB blocks, rows rounded down to a sublane multiple.
    tile_elems = max(TARGET_TILE_BYTES // itemsize, SUBLANES * width)
    tile_rows = max(SUBLANES, _round_down(tile_elems // width, SUBLANES))

    if rows <= tile_rows:
        # Small arrays: still try to give the (v7x) megacore two grid steps
        # when there are enough rows; otherwise one full-array block.
        half = _round_down(rows // 2, SUBLANES)
        tile_rows = half if half >= SUBLANES else rows

    grid = (pl.cdiv(rows, tile_rows),)   # ragged last block is masked by Pallas

    out_slab = pl.pallas_call(
        _exp_kernel,
        out_shape=jax.ShapeDtypeStruct((rows, width), slab.dtype),
        grid_spec=pltpu.PrefetchScalarGridSpec(
            num_scalar_prefetch=0,
            grid=grid,
            in_specs=[pl.BlockSpec((tile_rows, width), lambda i: (i, 0))],
            out_specs=pl.BlockSpec((tile_rows, width), lambda i: (i, 0)),
        ),
        compiler_params=pltpu.CompilerParams(
            dimension_semantics=("parallel",),
            vmem_limit_bytes=VMEM_LIMIT_BYTES,
        ),
    )(slab)

    if pad:
        return out_slab.reshape(-1)[:n].reshape(orig_shape)
    return out_slab.reshape(orig_shape)


if __name__ == "__main__":
    key = jax.random.PRNGKey(0)
    # NCHW input consistent with a conv-style feature map.
    x = jax.random.normal(key, (2, 4, 16, 16), dtype=jnp.float32)

    y = exp_pallas(x)
    jax.block_until_ready(y)

    # Correctness check against plain JAX reference.
    y_ref = jnp.exp(x)
    assert y.shape == x.shape and y.dtype == x.dtype
    assert jnp.allclose(y, y_ref, rtol=1e-6, atol=1e-6)

    print("KERNEL_OK")
</pallas_src>

<mosaic_0001>
module attributes {stable_mosaic.version = 11 : i64} {
  func.func @_exp_kernel(%arg0: i32, %arg1: memref<8x256xf32, #tpu.memory_space<vmem>>, %arg2: memref<8x256xf32, #tpu.memory_space<vmem>>) attributes {dimension_semantics = [#tpu.dimension_semantics<parallel>], iteration_bounds = array<i64: 1>, scalar_prefetch = 0 : i64, scratch_operands = 0 : i64, tpu.core_type = #tpu.core_type<tc>, window_params = [{transform_indices = @transform_0, window_bounds = array<i64: 8, 256>}, {transform_indices = @transform_1, window_bounds = array<i64: 8, 256>}]} {
    %c0 = arith.constant 0 : index
    %c0_0 = arith.constant 0 : index
    %0 = vector.load %arg1[%c0, %c0_0] : memref<8x256xf32, #tpu.memory_space<vmem>>, vector<8x256xf32>
    %1 = math.exp %0 : vector<8x256xf32>
    %c0_1 = arith.constant 0 : index
    %c0_2 = arith.constant 0 : index
    %2 = vector.load %arg2[%c0_1, %c0_2] : memref<8x256xf32, #tpu.memory_space<vmem>>, vector<8x256xf32>
    tpu.vector_store %arg2[%c0_1, %c0_2], %1 {strides = array<i32>} : memref<8x256xf32, #tpu.memory_space<vmem>>, vector<8x256xf32>,
    return
  }
  func.func @transform_0(%arg0: i32) -> (i32, i32) {
    %c0_i32 = arith.constant 0 : i32
    %c0_i32_0 = arith.constant 0 : i32
    return %arg0, %c0_i32 : i32, i32
  }
  func.func @transform_1(%arg0: i32) -> (i32, i32) {
    %c0_i32 = arith.constant 0 : i32
    %c0_i32_0 = arith.constant 0 : i32
    return %arg0, %c0_i32 : i32, i32
  }
}

</mosaic_0001>

<bundles_post_ra>
// kernel: tpu_custom_call.1
= control target key start
LH: loop header
LB: loop body
LE: loop exit
PB: predicated region body
PF: predicated region fallthrough
CT: control target
= control target key end

     0   :  { %6 = vsyncpa [#allocation3], 0  ;;  %s124_s0 = inlined_call_operand.hbm [shape: f32[8,256], index: 0, kind: input, shape index: {}]   ;;  %s125_s1 = inlined_call_operand.hbm [shape: f32[8,256], index: 1, kind: output, shape index: {}]  }
   0x1   :  { %7 = vsyncpa [#allocation4], 0  ;;  %s13_s8 = sshll.u32 %s124_s0, 4  ;;  %s106_s9 = smov [#allocation2]   ;;  %s14_s8 = int_to_ptr.hbm [resolvable:$true] %s13_s8 }
   0x2   :  { %s15_s10 = sshll.u32 %s106_s9, 4  ;;  %s16_s10 = int_to_ptr.vmem [resolvable:$true] %s15_s10 }
   0x3   :  { %18 = dma.hbm_to_vmem [thread:$0]  %s14_s8, 256, %s16_s10, [#allocation3]  }
   0x4   :  { %102 = dma.done.wait [#allocation3], 256  }
   0x5   :  { %103 = vsyncadd [#allocation3], 4294967040  ;;  %v23_v0 = vld [vmem:[#allocation2] sm:$0xff]  ;;  %v24_v1 = vld [vmem:[#allocation2 + $0x8] sm:$0xff]  ;;  %s107_s11 = smov [#allocation5]   ;;  %s38_s15 = sshll.u32 %s125_s1, 4  ;;  %s39_s15 = int_to_ptr.hbm [resolvable:$true] %s38_s15 }
   0x6   :  { %v25_v2 = vmul.f32 1.442695, %v23_v0  ;;  %v27_v3 = vmul.f32 1.442695, %v24_v1  ;;  %s36_s12 = sshll.u32 %s107_s11, 4  ;;  %s37_s12 = int_to_ptr.vmem [resolvable:$true] %s36_s12 }
   0x8   :  { %50 = vpow2.f32 %v25_v2 }
   0x9   :  { %52 = vpow2.f32 %v27_v3 }
   0xe   :  { %v51_v4 = vpop.eup %50 }
   0xf   :  { %v53_v5 = vpop.eup %52  ;;  %29 = vst [vmem:[#allocation5] sm:$0xff] %v51_v4 }
  0x10   :  { %30 = vst [vmem:[#allocation5 + $0x8] sm:$0xff] %v53_v5 }
  0x11   :  { %41 = dma.vmem_to_hbm [thread:$0]  %s37_s12, 256, %s39_s15, [#allocation4]  }
  0x12   :  { %104 = dma.done.wait [#allocation4], 256  }
  0x13   :  { %105 = vsyncadd [#allocation4], 4294967040 }
  0x14   :  { %46 = vsyncpa [#allocation3], 1 }
  0x15   :  { %47 = vsyncpa [#allocation4], 1 }

</bundles_post_ra>
